<compile_context>
chip_gen: v7x
topology: tpu7x:2x2x1
jax: 0.10.0
libtpu: 0.0.40
codegen_flags: <defaults>
</compile_context>

<pallas_src>
import jax
import jax.numpy as jnp
from jax import lax
from jax.experimental import pallas as pl
from jax.experimental.pallas import tpu as pltpu

IN_F, HID_F, OUT_F = 18, 11, 6
HID_PAD = 128          # hidden dim padded to one lane width (K of 2nd matmul)
OUT_PAD = 8            # output padded to 8 lanes (6 valid + 2 "masked" lanes)
SUB_PAD = 8            # batch rows rounded up to the sublane count
SLAB = 512             # rows per inner compute slab (bounds compute temps)
DEFAULT_TB = 8192      # rows per grid step (batch tile)
NEG_BIG = -1e30        # large finite negative logit for the padded lanes
VMEM_LIMIT_BYTES = 40 * 1024 * 1024


def _make_kernel(slab, n_slabs):
    def kernel(x_ref, w1_ref, b1_ref, w2_ref, o_ref):
        w1 = w1_ref[...]                                         # (18, 128)
        w2 = w2_ref[...]                                         # (128, 8)  bias + mask folded in
        b1 = jnp.broadcast_to(b1_ref[...], (slab, HID_PAD))      # hoisted out of the slab loop

        def compute_rows(r0):
            x = x_ref[pl.ds(r0, slab), :]                        # (slab, 18)
            # hidden = relu(x @ W1 + b1); column HID_F is exactly 1 (bias-fold lane)
            h = jnp.maximum(
                jnp.dot(x, w1, preferred_element_type=jnp.float32) + b1, 0.0)
            # logits (+b2 folded in); padded lanes get -1e30 from w2_p row HID_F
            z = jnp.dot(h, w2, preferred_element_type=jnp.float32)   # (slab, 8)
            m = jnp.max(z, axis=1, keepdims=True)
            e = jnp.exp(z - m)                                   # padded lanes underflow to 0
            denom = jnp.sum(e, axis=1, keepdims=True)
            o_ref[pl.ds(r0, slab), :] = e * pl.reciprocal(denom, approx=False)

        if n_slabs == 1:
            compute_rows(0)
        else:
            def slab_body(s, carry):
                compute_rows(pl.multiple_of(s * slab, slab))
                return carry
            lax.fori_loop(0, n_slabs, slab_body, 0)

    return kernel


def prepare_params(w1, b1, w2, b2):
    """One-time padding/folding of parameters to TPU-friendly shapes."""
    w1_p = jnp.zeros((IN_F, HID_PAD), jnp.float32).at[:, :HID_F].set(w1)
    # bias-fold lane: W1 col HID_F stays 0 and b1_p[HID_F] = 1 -> h[:, HID_F] == 1
    b1_p = jnp.zeros((1, HID_PAD), jnp.float32).at[0, :HID_F].set(b1)
    b1_p = b1_p.at[0, HID_F].set(1.0)
    w2_p = jnp.zeros((HID_PAD, OUT_PAD), jnp.float32)
    w2_p = w2_p.at[:HID_F, :OUT_F].set(w2)
    w2_p = w2_p.at[HID_F, :OUT_F].set(b2)          # b2 folded into the matmul
    w2_p = w2_p.at[HID_F, OUT_F:].set(NEG_BIG)     # padded lanes -> exp() == 0
    return w1_p, b1_p, w2_p


def _choose_tile(b_rounded, tb_max):
    """Batch-tile rows: multiple of SLAB, <= tb_max, >= ~4 tiles for big batches."""
    tb_max = max(SUB_PAD, (tb_max // SUB_PAD) * SUB_PAD)
    if b_rounded <= SLAB:
        return b_rounded
    tb = min(tb_max, (b_rounded // SLAB) * SLAB)
    if b_rounded >= 4 * SLAB:
        # keep both v7x TensorCores busy and let DMA overlap compute
        tb = min(tb, max(SLAB, (b_rounded // (4 * SLAB)) * SLAB))
    if tb > SLAB:
        tb = (tb // SLAB) * SLAB
    return tb


def net_forward(x, w1_p, b1_p, w2_p, *, tb_max=DEFAULT_TB):
    """x: (B, 18) float32; params from prepare_params. Returns (B, 6) softmax probs."""
    B = x.shape[0]
    b_rounded = ((B + SUB_PAD - 1) // SUB_PAD) * SUB_PAD
    # Only round up to a sublane multiple (<= 7 extra rows); never pad to tb.
    x_p = x if b_rounded == B else jnp.zeros((b_rounded, IN_F), jnp.float32).at[:B].set(x)

    tb = _choose_tile(b_rounded, tb_max)
    slab = tb if tb <= SLAB else SLAB
    n_slabs = tb // slab
    n_tiles = pl.cdiv(b_rounded, tb)   # ragged final block handled by Pallas

    out_p = pl.pallas_call(
        _make_kernel(slab, n_slabs),
        out_shape=jax.ShapeDtypeStruct((b_rounded, OUT_PAD), jnp.float32),
        grid=(n_tiles,),
        in_specs=[
            pl.BlockSpec((tb, IN_F), lambda i: (i, 0)),          # streamed activations
            pl.BlockSpec((IN_F, HID_PAD), lambda i: (0, 0)),     # VMEM-resident
            pl.BlockSpec((1, HID_PAD), lambda i: (0, 0)),        # VMEM-resident
            pl.BlockSpec((HID_PAD, OUT_PAD), lambda i: (0, 0)),  # VMEM-resident
        ],
        out_specs=pl.BlockSpec((tb, OUT_PAD), lambda i: (i, 0)),
        compiler_params=pltpu.CompilerParams(
            dimension_semantics=("parallel",),
            vmem_limit_bytes=VMEM_LIMIT_BYTES),
    )(x_p, w1_p, b1_p, w2_p)

    return out_p[:B, :OUT_F]


def init_params(key):
    """Deterministic init mirroring nn.Linear's U(-1/sqrt(fan_in), 1/sqrt(fan_in))."""
    k1, k2, k3, k4 = jax.random.split(key, 4)
    lim1 = 1.0 / jnp.sqrt(jnp.float32(IN_F))
    lim2 = 1.0 / jnp.sqrt(jnp.float32(HID_F))
    w1 = jax.random.uniform(k1, (IN_F, HID_F), jnp.float32, -lim1, lim1)
    b1 = jax.random.uniform(k2, (HID_F,), jnp.float32, -lim1, lim1)
    w2 = jax.random.uniform(k3, (HID_F, OUT_F), jnp.float32, -lim2, lim2)
    b2 = jax.random.uniform(k4, (OUT_F,), jnp.float32, -lim2, lim2)
    return w1, b1, w2, b2


def _reference(x, w1, b1, w2, b2):
    h = jnp.maximum(x @ w1 + b1, 0.0)
    return jax.nn.softmax(h @ w2 + b2, axis=1)


if __name__ == "__main__":
    key = jax.random.PRNGKey(0)
    kx, kx2, kp = jax.random.split(key, 3)
    w1, b1, w2, b2 = init_params(kp)
    # parameter padding / bias+mask folding happens once, outside the per-call path
    w1_p, b1_p, w2_p = prepare_params(w1, b1, w2, b2)

    # small-batch path (single tile, single slab)
    B = 4
    x = jax.random.normal(kx, (B, IN_F), jnp.float32)
    out = net_forward(x, w1_p, b1_p, w2_p)
    jax.block_until_ready(out)
    p_ref = _reference(x, w1, b1, w2, b2)
    assert out.shape == (B, OUT_F)
    assert jnp.allclose(out, p_ref, atol=1e-5), "mismatch vs reference (small batch)"
    assert jnp.allclose(jnp.sum(out, axis=1), 1.0, atol=1e-5)

    # multi-tile path with a ragged final block (exercises the tiled grid)
    B2 = 1000
    x2 = jax.random.normal(kx2, (B2, IN_F), jnp.float32)
    out2 = net_forward(x2, w1_p, b1_p, w2_p)
    jax.block_until_ready(out2)
    p_ref2 = _reference(x2, w1, b1, w2, b2)
    assert out2.shape == (B2, OUT_F)
    assert jnp.allclose(out2, p_ref2, atol=1e-5), "mismatch vs reference (tiled batch)"
    assert jnp.allclose(jnp.sum(out2, axis=1), 1.0, atol=1e-5)

    print("KERNEL_OK")
</pallas_src>

<mosaic_0001>
module attributes {stable_mosaic.version = 11 : i64} {
  func.func @kernel(%arg0: i32, %arg1: memref<8x18xf32, #tpu.memory_space<vmem>>, %arg2: memref<18x128xf32, #tpu.memory_space<vmem>>, %arg3: memref<1x128xf32, #tpu.memory_space<vmem>>, %arg4: memref<128x8xf32, #tpu.memory_space<vmem>>, %arg5: memref<8x8xf32, #tpu.memory_space<vmem>>) attributes {dimension_semantics = [#tpu.dimension_semantics<parallel>], iteration_bounds = array<i64: 1>, scalar_prefetch = 0 : i64, scratch_operands = 0 : i64, tpu.core_type = #tpu.core_type<tc>, window_params = [{transform_indices = @transform_0, window_bounds = array<i64: 8, 18>}, {pipeline_mode = #tpu.pipeline_mode<synchronous>, transform_indices = @transform_1, window_bounds = array<i64: 18, 128>}, {pipeline_mode = #tpu.pipeline_mode<synchronous>, transform_indices = @transform_2, window_bounds = array<i64: 1, 128>}, {pipeline_mode = #tpu.pipeline_mode<synchronous>, transform_indices = @transform_3, window_bounds = array<i64: 128, 8>}, {transform_indices = @transform_4, window_bounds = array<i64: 8, 8>}]} {
    %c0 = arith.constant 0 : index
    %c0_0 = arith.constant 0 : index
    %0 = vector.load %arg2[%c0, %c0_0] : memref<18x128xf32, #tpu.memory_space<vmem>>, vector<18x128xf32>
    %c0_1 = arith.constant 0 : index
    %c0_2 = arith.constant 0 : index
    %1 = vector.load %arg4[%c0_1, %c0_2] : memref<128x8xf32, #tpu.memory_space<vmem>>, vector<128x8xf32>
    %c0_3 = arith.constant 0 : index
    %c0_4 = arith.constant 0 : index
    %2 = vector.load %arg3[%c0_3, %c0_4] : memref<1x128xf32, #tpu.memory_space<vmem>>, vector<1x128xf32>
    %3 = vector.shape_cast %2 : vector<1x128xf32> to vector<1x128xf32>
    %4 = vector.broadcast %3 : vector<1x128xf32> to vector<8x128xf32>
    %c0_5 = arith.constant 0 : index
    %c0_6 = arith.constant 0 : index
    %5 = vector.load %arg1[%c0_5, %c0_6] : memref<8x18xf32, #tpu.memory_space<vmem>>, vector<8x18xf32>
    %cst = arith.constant dense<0.000000e+00> : vector<8x128xf32>
    %6 = tpu.matmul %5, %0, %cst {dimension_numbers = #tpu.dot_dimension_numbers<[1], [0], [0], [1], [0, 0, 1, 1], [], []>} : vector<8x18xf32>, vector<18x128xf32>, vector<8x128xf32> -> vector<8x128xf32>
    %7 = arith.addf %6, %4 : vector<8x128xf32>
    %cst_7 = arith.constant 0.000000e+00 : f32
    %8 = vector.broadcast %cst_7 : f32 to vector<8x128xf32>
    %9 = arith.maximumf %7, %8 : vector<8x128xf32>
    %cst_8 = arith.constant dense<0.000000e+00> : vector<8x8xf32>
    %10 = tpu.matmul %9, %1, %cst_8 {dimension_numbers = #tpu.dot_dimension_numbers<[1], [0], [0], [1], [0, 0, 1, 1], [], []>} : vector<8x128xf32>, vector<128x8xf32>, vector<8x8xf32> -> vector<8x8xf32>
    %cst_9 = arith.constant dense<0xFF800000> : vector<8xf32>
    %11 = vector.multi_reduction <maximumf>, %10, %cst_9 [1] : vector<8x8xf32> to vector<8xf32>
    %12 = vector.shape_cast %11 : vector<8xf32> to vector<8x1xf32>
    %13 = vector.broadcast %12 : vector<8x1xf32> to vector<8x8xf32>
    %14 = arith.subf %10, %13 : vector<8x8xf32>
    %15 = math.exp %14 : vector<8x8xf32>
    %cst_10 = arith.constant dense<0.000000e+00> : vector<8xf32>
    %16 = vector.multi_reduction <add>, %15, %cst_10 [1] : vector<8x8xf32> to vector<8xf32>
    %17 = vector.shape_cast %16 : vector<8xf32> to vector<8x1xf32>
    %18 = tpu.reciprocal %17 : vector<8x1xf32> -> vector<8x1xf32>
    %19 = vector.broadcast %18 : vector<8x1xf32> to vector<8x8xf32>
    %20 = arith.mulf %15, %19 : vector<8x8xf32>
    %c0_11 = arith.constant 0 : index
    %c0_12 = arith.constant 0 : index
    %21 = vector.load %arg5[%c0_11, %c0_12] : memref<8x8xf32, #tpu.memory_space<vmem>>, vector<8x8xf32>
    tpu.vector_store %arg5[%c0_11, %c0_12], %20 {strides = array<i32>} : memref<8x8xf32, #tpu.memory_space<vmem>>, vector<8x8xf32>,
    return
  }
  func.func @transform_0(%arg0: i32) -> (i32, i32) {
    %c0_i32 = arith.constant 0 : i32
    %c0_i32_0 = arith.constant 0 : i32
    return %arg0, %c0_i32 : i32, i32
  }
  func.func @transform_1(%arg0: i32) -> (i32, i32) {
    %c0_i32 = arith.constant 0 : i32
    %c0_i32_0 = arith.constant 0 : i32
    %c0_i32_1 = arith.constant 0 : i32
    return %c0_i32, %c0_i32_0 : i32, i32
  }
  func.func @transform_2(%arg0: i32) -> (i32, i32) {
    %c0_i32 = arith.constant 0 : i32
    %c0_i32_0 = arith.constant 0 : i32
    %c0_i32_1 = arith.constant 0 : i32
    return %c0_i32, %c0_i32_0 : i32, i32
  }
  func.func @transform_3(%arg0: i32) -> (i32, i32) {
    %c0_i32 = arith.constant 0 : i32
    %c0_i32_0 = arith.constant 0 : i32
    %c0_i32_1 = arith.constant 0 : i32
    return %c0_i32, %c0_i32_0 : i32, i32
  }
  func.func @transform_4(%arg0: i32) -> (i32, i32) {
    %c0_i32 = arith.constant 0 : i32
    %c0_i32_0 = arith.constant 0 : i32
    return %arg0, %c0_i32 : i32, i32
  }
}

</mosaic_0001>

<bundles_post_ra>
// kernel: tpu_custom_call.1
= control target key start
LH: loop header
LB: loop body
LE: loop exit
PB: predicated region body
PF: predicated region fallthrough
CT: control target
= control target key end

     0   :  { %v348_v2 = vmov 0.0|0.0   ;;  %vm349_vm0 = vmmov 0   ;;  %v350_v6 = vmov 0.0   ;;  %vm49_vm1 = vcmask 1041408   ;;  %s455_s0 = inlined_call_operand.vmem [shape: f32[8,18], index: 0, kind: input, shape index: {}]   ;;  %s456_s1 = inlined_call_operand.vmem [shape: f32[18,128], index: 1, kind: input, shape index: {}]   ;;  %s457_s2 = inlined_call_operand.vmem [shape: f32[1,128], index: 2, kind: input, shape index: {}]   ;;  %s458_s3 = inlined_call_operand.vmem [shape: f32[128,8], index: 3, kind: input, shape index: {}]   ;;  %s459_s4 = inlined_call_operand.hbm [shape: f32[8,8], index: 4, kind: output, shape index: {}]  }
   0x1   :  { %v18_v0 = vld [vmem:[%s456_s1] sm:$0xff]  ;;  %v19_v1 = vld [vmem:[%s456_s1 + $0x8] sm:$0xff]  ;;  %289 = vmatprep.subr.bf16.mxu0 %v348_v2  ;;  %292 = vmatprep.subr.bf16.mxu1 %v348_v2  ;;  %v23_v8 = vld [vmem:[%s458_s3 + $0x10] sm:$0xff]  ;;  %vm45_vm2 = vcmask 146432  }
   0x2   :  { %v290_v3 = vpack.c.bf16 %v19_v1, %v18_v0  ;;  %v21_v4 = vld [vmem:[%s458_s3] sm:$0xff]  ;;  %v22_v5 = vld [vmem:[%s458_s3 + $0x8] sm:$0xff]  ;;  %251 = vmatprep.mubr.msk.f32.mxu0 %vm349_vm0, %v350_v6  ;;  %v24_v9 = vld [vmem:[%s458_s3 + $0x18] sm:$0xff]  ;;  %286 = vmatprep.mubr.msk.f32.mxu1 %vm349_vm0, %v350_v6 }
   0x3   :  { %v293_v7 = vpack.c.bf16 %v22_v5, %v21_v4  ;;  %v20_v10 = vld [vmem:[%s456_s1 + $0x10] sm:$0x3]  ;;  %v296_v11 = vpack.c.bf16 %v24_v9, %v23_v8  ;;  %v44_v12 = vld [vmem:[%s455_s0] sm:$0xff]  ;;  %v26_v14 = vld [vmem:[%s458_s3 + $0x28] sm:$0xff] }
   0x4   :  { %291 = vmatpush3.bf16.msra.mxu0 %v290_v3  ;;  %v25_v13 = vld [vmem:[%s458_s3 + $0x20] sm:$0xff] }
   0x5   :  { %249 = vmatprep.subr.mxu0 %v350_v6  ;;  %294 = vmatpush3.bf16.msra.mxu1 %v293_v7 }
   0x6   :  { %295 = vmatprep.subr.bf16.mxu1 %v348_v2 }
   0x7   :  { %9 = vsyncpa [#allocation3], 0  ;;  %v299_v15 = vpack.c.bf16 %v26_v14, %v25_v13  ;;  %v27_v16 = vld [vmem:[%s458_s3 + $0x30] sm:$0xff]  ;;  %v28_v17 = vld [vmem:[%s458_s3 + $0x38] sm:$0xff]  ;;  %vm194_vm3 = vcmask 64512  }
   0x8   :  { %250 = vmatpush3.msk.msra.mxu0 %vm49_vm1, %v20_v10  ;;  %v302_v18 = vpack.c.bf16 %v28_v17, %v27_v16  ;;  %v29_v19 = vld [vmem:[%s458_s3 + $0x40] sm:$0xff]  ;;  %v30_v20 = vld [vmem:[%s458_s3 + $0x48] sm:$0xff]  ;;  %v31_v22 = vld [vmem:[%s458_s3 + $0x50] sm:$0xff] }
   0x9   :  { %252 = vmatmul.mubr.msk.f32.vlgmr.msra.gmra.mrb[0].mxu0 %vm45_vm2, %v44_v12  ;;  %297 = vmatpush3.bf16.msra.mxu1 %v296_v11  ;;  %v305_v21 = vpack.c.bf16 %v30_v20, %v29_v19  ;;  %v32_v23 = vld [vmem:[%s458_s3 + $0x58] sm:$0xff]  ;;  %v33_v25 = vld [vmem:[%s458_s3 + $0x60] sm:$0xff]  ;;  %v34_v26 = vld [vmem:[%s458_s3 + $0x68] sm:$0xff] }
   0xa   :  { %298 = vmatprep.subr.bf16.mxu1 %v348_v2  ;;  %v308_v24 = vpack.c.bf16 %v32_v23, %v31_v22  ;;  %v311_v27 = vpack.c.bf16 %v34_v26, %v33_v25  ;;  %v35_v28 = vld [vmem:[%s458_s3 + $0x70] sm:$0xff]  ;;  %v36_v29 = vld [vmem:[%s458_s3 + $0x78] sm:$0xff]  ;;  %v221_v31 = vld [vmem:[%s457_s2] ss:$0 sm:$0xff]  ;;  %s351_s2 = smov [#allocation2]  }
   0xb   :  { %v314_v30 = vpack.c.bf16 %v36_v29, %v35_v28  ;;  %s213_s3 = sshll.u32 %s351_s2, 4  ;;  %s214_s3 = int_to_ptr.vmem [resolvable:$true] %s213_s3 }
   0xc   :  { %s324_s29 = scalar_lea.vmem %s214_s3, 128  ;;  %p329_p1 = scmp.lt.s32.totalorder %s214_s3, %s214_s3 }
   0xd   :  { %300 = vmatpush3.bf16.msra.mxu1 %v299_v15  ;;  %p325_p0 = scmp.ne.s32.totalorder %s214_s3, %s324_s29  ;;  %p330_p2 = scmp.lt.s32.totalorder %s324_s29, %s324_s29 }
   0xe   :  { %301 = vmatprep.subr.bf16.mxu1 %v348_v2 }
   0xf   :  { %p331_p3 = por %p330_p2, %p329_p1 }
  0x11   :  { %303 = vmatpush3.bf16.msra.mxu1 %v302_v18  ;;  %p332_p4 = pnand %p331_p3, %p325_p0 }
  0x12   :  { %304 = vmatprep.subr.bf16.mxu1 %v348_v2 }
  0x15   :  { %306 = vmatpush3.bf16.msra.mxu1 %v305_v21 }
  0x16   :  { %307 = vmatprep.subr.bf16.mxu1 %v348_v2 }
  0x19   :  { %309 = vmatpush3.bf16.msra.mxu1 %v308_v24 }
  0x1a   :  { %310 = vmatprep.subr.bf16.mxu1 %v348_v2 }
  0x1d   :  { %312 = vmatpush3.bf16.msra.mxu1 %v311_v27 }
  0x1e   :  { %313 = vmatprep.subr.bf16.mxu1 %v348_v2 }
  0x21   :  { %315 = vmatpush3.bf16.msra.mxu1 %v314_v30 }
  0xdc   :  { %v119_v32 = vpop.f32.mrb[0].mxu0 }
  0xdd   :  { %v120_v33 = vadd.f32 %v221_v31, %v119_v32  ;;  %v253_v34 = vpop.f32.mrb[1].mxu0 }
  0xdf   :  { %v123_v35 = vmax.f32 %v120_v33, 0.0 }
  0xe1   :  { %287 = vmatmul.mubr.f32.vlgmr.msra.gmra.mrb[0].mxu1 %v123_v35 }
 0x1b4   :  { %v190_v36 = vpop.f32.mrb[0].mxu1 }
 0x1b5   :  { %v288_v37 = vpop.f32.mrb[1].mxu1  ;;  %v195_v38 = vsel %vm194_vm3, %v190_v36, -inf }
 0x1b6   :  { %196 = vmax.xlane.f32.xlu0 %v195_v38 }
 0x243   :  { %v197_v39 = vpop.xlane.xlu0 %196 }
 0x244   :  { %v198_v40 = vsub.f32 %v190_v36, %v197_v39 }
 0x246   :  { %v199_v41 = vmul.f32 1.442695, %v198_v40 }
 0x248   :  { %320 = vpow2.f32 %v199_v41 }
 0x252   :  { %v321_v42 = vpop.eup %320 }
 0x253   :  { %v201_v43 = vsel %vm194_vm3, %v321_v42, 0.0 }
 0x254   :  { %202 = vadd.xlane.f32.xlu0 %v201_v43 }
 0x2e1   :  { %v203_v44 = vpop.xlane.xlu0 %202 }
 0x2e2   :  { %322 = vrcp.f32 %v203_v44 }
 0x2ec   :  { %v323_v45 = vpop.eup %322 }
 0x2ed   :  { %v205_v46 = vmul.f32 %v323_v45, %v321_v42 }
 0x2ef   :  { %206 = vst.msk [vmem:[#allocation2] sm:$0xff] %vm194_vm3, %v205_v46 }
 0x2f0   :  { %335 = shalt.err (!%p332_p4)
}
 0x2f1   :  { %s336_s6 = scalar_lea.hbm %s459_s4, 128 }
 0x2f2   :  { %p337_p5 = scmp.ne.s32.totalorder %s459_s4, %s336_s6  ;;  %p340_p6 = scmp.lt.u32.totalorder %s336_s6, %s459_s4 }
 0x2f4   :  { %p342_p7 = pnand %p340_p6, %p337_p5 }
 0x2f6   :  { %345 = shalt.err (!%p342_p7)
}
 0x2f7   :  { %216 = dma.vmem_to_hbm [thread:$0]  %s214_s3, 128, %s459_s4, [#allocation3]  }
 0x2f8   :  { %346 = dma.done.wait [#allocation3], 128  }
 0x2f9   :  { %347 = vsyncadd [#allocation3], 4294967168 }
 0x2fa   :  { %220 = vsyncpa [#allocation3], 1 }

</bundles_post_ra>
